<compile_context>
chip_gen: v7x
topology: tpu7x:2x2x1
jax: 0.10.0
libtpu: 0.0.40
codegen_flags: <defaults>
</compile_context>

<pallas_src>
import functools

import jax
import jax.numpy as jnp
from jax.experimental import pallas as pl
from jax.experimental.pallas import tpu as pltpu


_LANE = 512            # last-dim width: multiple of 128 -> unmasked full-lane stores
_MAX_TILE_ROWS = 1024  # 1024 * 512 * 4 B = 2 MiB / f32 block (in+out dbl-buffered ~= 8 MiB)
_MIN_GRID_STEPS = 8    # keep >= 8 steps on big tensors so v7x's 2 TCs each get >= 4


def _sigmoid_range_kernel(x_ref, o_ref, *, low, high):
    """out = sigmoid(x) * (high - low) + low on one (tile_rows, _LANE) block."""
    x = x_ref[...].astype(jnp.float32)
    # sigmoid(x) = 1 / (1 + exp(-x)); exp runs on the EUP, mul/add on the VPU.
    # exp(-x) overflowing to +inf for very negative x correctly yields 0.0.
    sig = 1.0 / (1.0 + jnp.exp(-x))
    o_ref[...] = (sig * (high - low) + low).astype(o_ref.dtype)


def _choose_tile_rows(rows: int) -> int:
    """Pick a sublane-aligned row tile: big blocks, but keep a multi-step grid."""
    if rows <= 8:
        return rows                        # single full-array block (no (8,128) constraint)
    cand = -(-rows // _MIN_GRID_STEPS)     # aim for >= _MIN_GRID_STEPS grid steps
    cand = -(-cand // 8) * 8               # sublane-align (block rows must be a multiple of 8)
    cand = max(8, min(cand, _MAX_TILE_ROWS))
    if cand >= rows:
        return rows                        # whole array fits in one block
    return cand


def sigmoid_range(x, low, high):
    """Pallas TPU implementation of sigmoid_range(x, low, high). Any shape."""
    # NOTE: low/high are baked in as compile-time constants (they are Python
    # constants in the PyTorch module). If traced scalars were ever needed they
    # would have to be passed as SMEM scalar inputs instead.
    orig_shape = x.shape
    orig_dtype = x.dtype
    n = x.size

    rows = -(-n // _LANE)
    padded = rows * _LANE

    flat = x.reshape(-1)
    if padded != n:
        # Only pad the ragged lane tail (< 512 elements), never to a row-tile multiple.
        flat = jnp.pad(flat, (0, padded - n))
    x2d = flat.reshape(rows, _LANE)

    tile_rows = _choose_tile_rows(rows)
    grid = (pl.cdiv(rows, tile_rows),)     # ragged last row-block handled by Pallas

    out2d = pl.pallas_call(
        functools.partial(_sigmoid_range_kernel, low=float(low), high=float(high)),
        out_shape=jax.ShapeDtypeStruct((rows, _LANE), orig_dtype),
        grid=grid,
        in_specs=[pl.BlockSpec((tile_rows, _LANE), lambda i: (i, 0))],
        out_specs=pl.BlockSpec((tile_rows, _LANE), lambda i: (i, 0)),
        compiler_params=pltpu.CompilerParams(
            dimension_semantics=("parallel",),
            vmem_limit_bytes=48 << 20,     # headroom on v5e's 16 MiB default, safe on v7x
        ),
    )(x2d)

    out_flat = out2d.reshape(-1)
    if padded != n:
        out_flat = out_flat[:n]
    return out_flat.reshape(orig_shape)


class SigmoidRange:
    """Mirror of the PyTorch SigmoidRange module (forward only)."""

    def __init__(self, low, high):
        self.low, self.high = low, high

    def __call__(self, x):
        return sigmoid_range(x, self.low, self.high)


def _reference_forward(x, low, high):
    """Pure-JAX reference: torch.sigmoid(x) * (high - low) + low."""
    return jax.nn.sigmoid(x.astype(jnp.float32)) * (high - low) + low


if __name__ == "__main__":
    key = jax.random.PRNGKey(0)
    N, C, H, W = 2, 4, 16, 16
    x = jax.random.normal(key, (N, C, H, W), jnp.float32)   # NCHW, PyTorch layout
    low, high = -3.0, 3.0

    mod = SigmoidRange(low, high)
    out = jax.block_until_ready(mod(x))
    ref = jax.block_until_ready(_reference_forward(x, low, high))

    assert out.shape == (N, C, H, W)
    assert jnp.allclose(out, ref, atol=1e-4, rtol=1e-4)
    print("KERNEL_OK")
</pallas_src>

<mosaic_0001>
module attributes {stable_mosaic.version = 11 : i64} {
  func.func @_sigmoid_range_kernel(%arg0: i32, %arg1: memref<4x512xf32, #tpu.memory_space<vmem>>, %arg2: memref<4x512xf32, #tpu.memory_space<vmem>>) attributes {dimension_semantics = [#tpu.dimension_semantics<parallel>], iteration_bounds = array<i64: 1>, scalar_prefetch = 0 : i64, scratch_operands = 0 : i64, tpu.core_type = #tpu.core_type<tc>, window_params = [{transform_indices = @transform_0, window_bounds = array<i64: 4, 512>}, {transform_indices = @transform_1, window_bounds = array<i64: 4, 512>}]} {
    %c0 = arith.constant 0 : index
    %c0_0 = arith.constant 0 : index
    %0 = vector.load %arg1[%c0, %c0_0] : memref<4x512xf32, #tpu.memory_space<vmem>>, vector<4x512xf32>
    %cst = arith.constant 0.000000e+00 : f32
    %1 = vector.broadcast %cst : f32 to vector<4x512xf32>
    %2 = arith.subf %1, %0 : vector<4x512xf32>
    %3 = math.exp %2 : vector<4x512xf32>
    %cst_1 = arith.constant 1.000000e+00 : f32
    %4 = vector.broadcast %cst_1 : f32 to vector<4x512xf32>
    %5 = arith.addf %4, %3 : vector<4x512xf32>
    %cst_2 = arith.constant 1.000000e+00 : f32
    %6 = vector.broadcast %cst_2 : f32 to vector<4x512xf32>
    %7 = arith.divf %6, %5 : vector<4x512xf32>
    %cst_3 = arith.constant 6.000000e+00 : f32
    %8 = vector.broadcast %cst_3 : f32 to vector<4x512xf32>
    %9 = arith.mulf %7, %8 : vector<4x512xf32>
    %cst_4 = arith.constant -3.000000e+00 : f32
    %10 = vector.broadcast %cst_4 : f32 to vector<4x512xf32>
    %11 = arith.addf %9, %10 : vector<4x512xf32>
    %c0_5 = arith.constant 0 : index
    %c0_6 = arith.constant 0 : index
    %12 = vector.load %arg2[%c0_5, %c0_6] : memref<4x512xf32, #tpu.memory_space<vmem>>, vector<4x512xf32>
    tpu.vector_store %arg2[%c0_5, %c0_6], %11 {strides = array<i32>} : memref<4x512xf32, #tpu.memory_space<vmem>>, vector<4x512xf32>,
    return
  }
  func.func @transform_0(%arg0: i32) -> (i32, i32) {
    %c0_i32 = arith.constant 0 : i32
    %c0_i32_0 = arith.constant 0 : i32
    return %arg0, %c0_i32 : i32, i32
  }
  func.func @transform_1(%arg0: i32) -> (i32, i32) {
    %c0_i32 = arith.constant 0 : i32
    %c0_i32_0 = arith.constant 0 : i32
    return %arg0, %c0_i32 : i32, i32
  }
}

</mosaic_0001>

<bundles_post_ra>
// kernel: tpu_custom_call.1
= control target key start
LH: loop header
LB: loop body
LE: loop exit
PB: predicated region body
PF: predicated region fallthrough
CT: control target
= control target key end

     0   :  { %6 = vsyncpa [#allocation3], 0  ;;  %s150_s0 = inlined_call_operand.hbm [shape: f32[4,512], index: 0, kind: input, shape index: {}]   ;;  %s151_s1 = inlined_call_operand.hbm [shape: f32[4,512], index: 1, kind: output, shape index: {}]  }
   0x1   :  { %7 = vsyncpa [#allocation4], 0  ;;  %s114_s6 = smov [#allocation2]   ;;  %s66_s10 = scalar_lea.hbm %s150_s0, 256 }
   0x2   :  { %s14_s7 = sshll.u32 %s114_s6, 4  ;;  %p67_p0 = scmp.ne.s32.totalorder %s150_s0, %s66_s10  ;;  %s15_s7 = int_to_ptr.vmem [resolvable:$true] %s14_s7 }
   0x3   :  { %p70_p1 = scmp.lt.u32.totalorder %s66_s10, %s150_s0 }
   0x5   :  { %p72_p2 = pnand %p70_p1, %p67_p0 }
   0x7   :  { %75 = shalt.err (!%p72_p2)
}
   0x8   :  { %s76_s15 = scalar_lea.vmem %s15_s7, 256  ;;  %p81_p4 = scmp.lt.s32.totalorder %s15_s7, %s15_s7 }
   0x9   :  { %p77_p3 = scmp.ne.s32.totalorder %s15_s7, %s76_s15  ;;  %p82_p5 = scmp.lt.s32.totalorder %s76_s15, %s76_s15 }
   0xb   :  { %p83_p6 = por %p82_p5, %p81_p4 }
   0xd   :  { %p84_p7 = pnand %p83_p6, %p77_p3 }
   0xf   :  { %87 = shalt.err (!%p84_p7)
}
  0x10   :  { %17 = dma.hbm_to_vmem [thread:$0]  %s150_s0, 256, %s15_s7, [#allocation3]  }
  0x11   :  { %110 = dma.done.wait [#allocation3], 256  }
  0x12   :  { %111 = vsyncadd [#allocation3], 4294967040  ;;  %v21_v0 = vld [vmem:[#allocation2] sm:$0xff]  ;;  %v22_v1 = vld [vmem:[#allocation2 + $0x8] sm:$0xff]  ;;  %s115_s0 = smov [#allocation5]  }
  0x13   :  { %v23_v2 = vsub.f32 0.0, %v21_v0  ;;  %v24_v3 = vsub.f32 0.0, %v22_v1  ;;  %s47_s18 = sshll.u32 %s115_s0, 4  ;;  %s48_s18 = int_to_ptr.vmem [resolvable:$true] %s47_s18 }
  0x14   :  { %s88_s19 = scalar_lea.vmem %s48_s18, 256  ;;  %p93_p9 = scmp.lt.s32.totalorder %s48_s18, %s48_s18 }
  0x15   :  { %v25_v4 = vmul.f32 1.442695, %v23_v2  ;;  %v27_v5 = vmul.f32 1.442695, %v24_v3  ;;  %p89_p8 = scmp.ne.s32.totalorder %s48_s18, %s88_s19  ;;  %p94_p10 = scmp.lt.s32.totalorder %s88_s19, %s88_s19 }
  0x17   :  { %58 = vpow2.f32 %v25_v4  ;;  %p95_p11 = por %p94_p10, %p93_p9 }
  0x18   :  { %60 = vpow2.f32 %v27_v5 }
  0x19   :  { %p96_p12 = pnand %p95_p11, %p89_p8 }
  0x21   :  { %v59_v6 = vpop.eup %58 }
  0x22   :  { %v61_v7 = vpop.eup %60  ;;  %v29_v8 = vadd.f32 1.0, %v59_v6 }
  0x23   :  { %v30_v9 = vadd.f32 1.0, %v61_v7 }
  0x24   :  { %62 = vrcp.f32 %v29_v8 }
  0x25   :  { %64 = vrcp.f32 %v30_v9 }
  0x2e   :  { %v63_v10 = vpop.eup %62 }
  0x2f   :  { %v65_v11 = vpop.eup %64  ;;  %v35_v12 = vmul.f32 6.0, %v63_v10 }
  0x30   :  { %v36_v13 = vmul.f32 6.0, %v65_v11 }
  0x31   :  { %v37_v14 = vadd.f32 -3.0, %v35_v12 }
  0x32   :  { %v38_v15 = vadd.f32 -3.0, %v36_v13 }
  0x33   :  { %39 = vst [vmem:[#allocation5] sm:$0xff] %v37_v14 }
  0x34   :  { %40 = vst [vmem:[#allocation5 + $0x8] sm:$0xff] %v38_v15 }
  0x35   :  { %99 = shalt.err (!%p96_p12)
}
  0x36   :  { %s100_s22 = scalar_lea.hbm %s151_s1, 256 }
  0x37   :  { %p101_p13 = scmp.ne.s32.totalorder %s151_s1, %s100_s22  ;;  %p104_p0 = scmp.lt.u32.totalorder %s100_s22, %s151_s1 }
  0x39   :  { %p106_p1 = pnand %p104_p0, %p101_p13 }
  0x3b   :  { %109 = shalt.err (!%p106_p1)
}
  0x3c   :  { %50 = dma.vmem_to_hbm [thread:$0]  %s48_s18, 256, %s151_s1, [#allocation4]  }
  0x3d   :  { %112 = dma.done.wait [#allocation4], 256  }
  0x3e   :  { %113 = vsyncadd [#allocation4], 4294967040 }
  0x3f   :  { %54 = vsyncpa [#allocation3], 1 }
  0x40   :  { %55 = vsyncpa [#allocation4], 1 }

</bundles_post_ra>
